<compile_context>
chip_gen: v5e
topology: v5e:2x2
jax: 0.10.0
libtpu: 0.0.40
codegen_flags: <defaults>
</compile_context>

<pallas_src>
import math

import jax
import jax.numpy as jnp
from jax.experimental import pallas as pl
from jax.experimental.pallas import tpu as pltpu


def _round_up(x: int, m: int) -> int:
    return ((x + m - 1) // m) * m


def _multimode_loss_kernel(params_ref, *refs):
    """params_ref: SMEM (M+1,) f32 = [a_0 .. a_{M-1}, c].
    refs: M loss tiles (VMEM, native dtype) followed by the output tile.
    Computes out = a_0*l_0 + ... + a_{M-1}*l_{M-1} + c elementwise."""
    *loss_refs, out_ref = refs
    num_modes = len(loss_refs)
    acc = loss_refs[0][...].astype(jnp.float32) * params_ref[0]
    for m in range(1, num_modes):
        acc = acc + loss_refs[m][...].astype(jnp.float32) * params_ref[m]
    acc = acc + params_ref[num_modes]
    out_ref[...] = acc.astype(out_ref.dtype)


def multimode_loss(losses, loss_weights, *, learnable: bool,
                   tile_rows: int = 1024, tile_cols: int = 1024,
                   out_dtype=None):
    """Combine per-mode loss tensors with (learnable or fixed) weights.

    losses:       list of M arrays, all the same shape (any rank), any float dtype.
    loss_weights: float array with at least M entries (the module's loss_weights).
    Returns the combined loss with the same shape as each input.
    """
    losses = list(losses)
    M = len(losses)
    assert M >= 1
    assert tile_rows % 8 == 0 and tile_cols % 128 == 0
    orig_shape = losses[0].shape
    for l in losses:
        assert l.shape == orig_shape, "all per-mode losses must share a shape"

    if out_dtype is None:
        # Match torch promotion: losses dtype promoted with f32 weights.
        out_dtype = jnp.promote_types(jnp.result_type(*losses), jnp.float32)

    n_elems = int(math.prod(orig_shape))  # () -> 1
    if n_elems == 0:
        return jnp.zeros(orig_shape, out_dtype)

    # Per-mode scale and single additive constant, hoisted out of the kernel.
    w = jnp.asarray(loss_weights, dtype=jnp.float32)[:M]
    if learnable:
        scales = 0.5 * jnp.exp(-w)          # (M,)
        const = 0.5 * jnp.sum(w)            # scalar
    else:
        scales = w
        const = jnp.zeros((), dtype=jnp.float32)
    params = jnp.concatenate([scales, const[None]]).astype(jnp.float32)  # (M+1,)

    # ---- choose a lane-dense 2-D view (rows, cols) without padding if possible ----
    rank = len(orig_shape)
    need_pad = False
    if rank >= 2 and orig_shape[-1] % 128 == 0:
        # Common ML case: keep the trailing dim, merge the leading dims (metadata
        # reshape; identity when rank == 2).  No pad, no output slice.
        cols = orig_shape[-1]
        rows = n_elems // cols
    elif n_elems >= 128 and n_elems % 128 == 0:
        # Total element count is lane-aligned: find the widest 128-multiple lane
        # width (<= tile_cols) that divides it.  Still no pad / slice.
        cols = 128
        for cand in range(min(tile_cols, n_elems) // 128 * 128, 127, -128):
            if n_elems % cand == 0:
                cols = cand
                break
        rows = n_elems // cols
    else:
        # TODO(synk): truly 128-unaligned totals (e.g. scalar losses) take a small
        # flatten+pad pass; for large ragged tensors an in-kernel masked tail
        # (pltpu.store mask on the final block) would remove this extra HBM pass.
        need_pad = True
        cols = 128
        rows = pl.cdiv(n_elems, 128)

    # ---- tile sizes ----
    tc = min(cols, tile_cols)                   # cols and tile_cols are 128-multiples
    if rows <= 8:
        tr = rows                               # full-dim block (allowed regardless of 8)
    else:
        # >=2 row-tiles so the parallel grid can use both v7x TensorCores.
        tr = min(tile_rows, _round_up(pl.cdiv(rows, 2), 8))

    itemsizes = [jnp.dtype(l.dtype).itemsize for l in losses]
    out_item = jnp.dtype(out_dtype).itemsize

    def _footprint(tr_, tc_):
        # double-buffered inputs + output
        return 2 * tr_ * tc_ * (sum(itemsizes) + out_item)

    try:
        vmem_cap = int(pltpu.get_tpu_info().vmem_capacity_bytes)
    except Exception:
        vmem_cap = 64 * 1024 * 1024             # conservative (v7x per-TC)
    budget = vmem_cap // 2
    while _footprint(tr, tc) > budget and tr > 8:
        tr = max(8, _round_up(tr // 2, 8))
    while _footprint(tr, tc) > budget and tc > 128:
        tc = max(128, (tc // 2) // 128 * 128)
    vmem_limit = int(min(vmem_cap, max(16 << 20, _footprint(tr, tc) + (4 << 20))))

    grid = (pl.cdiv(rows, tr), pl.cdiv(cols, tc))

    def to_view(x):
        if need_pad:
            flat = jnp.ravel(x)
            pad = rows * cols - n_elems
            if pad:
                flat = jnp.pad(flat, (0, pad))
            return flat.reshape(rows, cols)
        return jnp.reshape(x, (rows, cols))     # metadata-only in the common case

    views = [to_view(l) for l in losses]        # native dtypes preserved

    total_bytes = rows * cols * (sum(itemsizes) + out_item)

    grid_spec = pltpu.PrefetchScalarGridSpec(
        num_scalar_prefetch=1,                  # params -> SMEM
        grid=grid,
        in_specs=[pl.BlockSpec((tr, tc), lambda i, j, p: (i, j)) for _ in range(M)],
        out_specs=pl.BlockSpec((tr, tc), lambda i, j, p: (i, j)),
    )

    out2d = pl.pallas_call(
        _multimode_loss_kernel,
        out_shape=jax.ShapeDtypeStruct((rows, cols), out_dtype),
        grid_spec=grid_spec,
        compiler_params=pltpu.CompilerParams(
            dimension_semantics=("parallel", "parallel"),
            vmem_limit_bytes=vmem_limit,
        ),
        cost_estimate=pl.CostEstimate(
            flops=2 * M * rows * cols,
            transcendentals=0,
            bytes_accessed=total_bytes,
        ),
    )(params, *views)

    if need_pad:
        return out2d.reshape(-1)[:n_elems].reshape(orig_shape)
    return jnp.reshape(out2d, orig_shape)


class MultiModeLossJAX:
    """JAX/Pallas port of MultiModeLoss (forward pass). Deterministic init."""

    def __init__(self, weights=None):
        weights = [1.0, 1.0] if weights == "fixed" else weights
        if weights == "learnable":
            self.learnable = True
            # nn.Parameter(torch.tensor([0.0, 0.0]))
            self.loss_weights = jnp.zeros((2,), dtype=jnp.float32)
        else:
            self.learnable = False
            self.loss_weights = jnp.asarray(weights, dtype=jnp.float32)

    def __call__(self, losses):
        return multimode_loss(list(losses), self.loss_weights,
                              learnable=self.learnable)

    def weight_vals(self):
        if self.learnable:
            return [float(v) for v in jnp.exp(-self.loss_weights)]
        return [float(v) for v in self.loss_weights]


if __name__ == "__main__":
    key = jax.random.PRNGKey(0)
    k0, k1, k2, k3 = jax.random.split(key, 4)

    # ---- Case 1: lane-aligned f32 (8, 128): no reshape / no pad, both branches ----
    B, D = 8, 128
    loss_a = jax.random.uniform(k0, (B, D), dtype=jnp.float32)
    loss_b = jax.random.uniform(k1, (B, D), dtype=jnp.float32)

    mod_learn = MultiModeLossJAX("learnable")
    out_learn = jax.block_until_ready(mod_learn([loss_a, loss_b]))
    w = mod_learn.loss_weights
    ref_learn = sum(
        0.5 * jnp.exp(-w[i]) * [loss_a, loss_b][i] + 0.5 * w[i] for i in range(2)
    )
    assert out_learn.shape == (B, D) and out_learn.dtype == jnp.float32
    assert jnp.allclose(out_learn, ref_learn, atol=1e-6, rtol=1e-6)

    mod_fixed = MultiModeLossJAX("fixed")
    out_fixed = jax.block_until_ready(mod_fixed([loss_a, loss_b]))
    assert jnp.allclose(out_fixed, loss_a + loss_b, atol=1e-6, rtol=1e-6)

    # ---- Case 2: bf16, last dim not 128-aligned but total is (3*200*96 = 450*128):
    #              dividing-lane-width path, native-dtype DMA, partial row edge ----
    shape2 = (3, 200, 96)
    la = jax.random.normal(k2, shape2, dtype=jnp.bfloat16)
    lb = jax.random.normal(k3, shape2, dtype=jnp.bfloat16)
    out2 = jax.block_until_ready(mod_learn([la, lb]))
    ref2 = sum(
        0.5 * jnp.exp(-w[i]) * jnp.asarray([la, lb][i], jnp.float32) + 0.5 * w[i]
        for i in range(2)
    )
    assert out2.shape == shape2 and out2.dtype == jnp.float32
    assert jnp.allclose(out2, ref2, atol=1e-5, rtol=1e-5)

    # ---- Case 3: 128-aligned trailing dim with leading-dim merge + ragged rows ----
    shape3 = (4, 3, 256)   # rows = 12 -> tr = 8, grid rows = 2 (masked edge block)
    lc = jax.random.uniform(k0, shape3, dtype=jnp.float32)
    ld = jax.random.uniform(k1, shape3, dtype=jnp.float32)
    out3 = jax.block_until_ready(
        multimode_loss([lc, ld], jnp.asarray([2.0, 0.5], jnp.float32), learnable=False)
    )
    assert out3.shape == shape3
    assert jnp.allclose(out3, 2.0 * lc + 0.5 * ld, atol=1e-6, rtol=1e-6)

    # ---- Case 4: truly ragged small shape (pad fallback path) ----
    shape4 = (5, 7, 9)     # 315 elements, not a multiple of 128
    le = jax.random.uniform(k2, shape4, dtype=jnp.float32)
    lf = jax.random.uniform(k3, shape4, dtype=jnp.float32)
    out4 = jax.block_until_ready(mod_fixed([le, lf]))
    assert out4.shape == shape4
    assert jnp.allclose(out4, le + lf, atol=1e-6, rtol=1e-6)

    # ---- Case 5: scalar per-mode losses (the typical call site) ----
    s0 = jnp.asarray(1.37, jnp.float32)
    s1 = jnp.asarray(0.42, jnp.float32)
    out5 = jax.block_until_ready(mod_learn([s0, s1]))
    ref5 = sum(0.5 * jnp.exp(-w[i]) * [s0, s1][i] + 0.5 * w[i] for i in range(2))
    assert out5.shape == ()
    assert jnp.allclose(out5, ref5, atol=1e-6, rtol=1e-6)

    print("KERNEL_OK")
</pallas_src>

<mosaic_0001>
module attributes {stable_mosaic.version = 11 : i64} {
  func.func @_multimode_loss_kernel(%arg0: i32, %arg1: i32, %arg2: memref<3xf32, #tpu.memory_space<smem>>, %arg3: memref<8x128xf32, #tpu.memory_space<vmem>>, %arg4: memref<8x128xf32, #tpu.memory_space<vmem>>, %arg5: memref<8x128xf32, #tpu.memory_space<vmem>>) attributes {dimension_semantics = [#tpu.dimension_semantics<parallel>, #tpu.dimension_semantics<parallel>], iteration_bounds = array<i64: 1, 1>, scalar_prefetch = 1 : i64, scratch_operands = 0 : i64, tpu.core_type = #tpu.core_type<tc>, window_params = [{transform_indices = @transform_0, window_bounds = array<i64: 8, 128>}, {transform_indices = @transform_1, window_bounds = array<i64: 8, 128>}, {transform_indices = @transform_2, window_bounds = array<i64: 8, 128>}]} {
    %c0 = arith.constant 0 : index
    %c0_0 = arith.constant 0 : index
    %0 = vector.load %arg3[%c0, %c0_0] : memref<8x128xf32, #tpu.memory_space<vmem>>, vector<8x128xf32>
    %c0_1 = arith.constant 0 : index
    %1 = memref.load %arg2[%c0_1] : memref<3xf32, #tpu.memory_space<smem>>
    %2 = vector.broadcast %1 : f32 to vector<8x128xf32>
    %3 = arith.mulf %0, %2 : vector<8x128xf32>
    %c0_2 = arith.constant 0 : index
    %c0_3 = arith.constant 0 : index
    %4 = vector.load %arg4[%c0_2, %c0_3] : memref<8x128xf32, #tpu.memory_space<vmem>>, vector<8x128xf32>
    %c1 = arith.constant 1 : index
    %5 = memref.load %arg2[%c1] : memref<3xf32, #tpu.memory_space<smem>>
    %6 = vector.broadcast %5 : f32 to vector<8x128xf32>
    %7 = arith.mulf %4, %6 : vector<8x128xf32>
    %8 = arith.addf %3, %7 : vector<8x128xf32>
    %c2 = arith.constant 2 : index
    %9 = memref.load %arg2[%c2] : memref<3xf32, #tpu.memory_space<smem>>
    %10 = vector.broadcast %9 : f32 to vector<8x128xf32>
    %11 = arith.addf %8, %10 : vector<8x128xf32>
    %c0_4 = arith.constant 0 : index
    %c0_5 = arith.constant 0 : index
    %12 = vector.load %arg5[%c0_4, %c0_5] : memref<8x128xf32, #tpu.memory_space<vmem>>, vector<8x128xf32>
    tpu.vector_store %arg5[%c0_4, %c0_5], %11 {strides = array<i32>} : memref<8x128xf32, #tpu.memory_space<vmem>>, vector<8x128xf32>,
    return
  }
  func.func @transform_0(%arg0: i32, %arg1: i32, %arg2: memref<3xf32, #tpu.memory_space<smem>>) -> (i32, i32) {
    %c0_i32 = arith.constant 0 : i32
    return %arg0, %arg1 : i32, i32
  }
  func.func @transform_1(%arg0: i32, %arg1: i32, %arg2: memref<3xf32, #tpu.memory_space<smem>>) -> (i32, i32) {
    %c0_i32 = arith.constant 0 : i32
    return %arg0, %arg1 : i32, i32
  }
  func.func @transform_2(%arg0: i32, %arg1: i32, %arg2: memref<3xf32, #tpu.memory_space<smem>>) -> (i32, i32) {
    %c0_i32 = arith.constant 0 : i32
    return %arg0, %arg1 : i32, i32
  }
}

</mosaic_0001>

<bundles_post_ra>
// kernel: tpu_custom_call.1
= control target key start
LH: loop header
LB: loop body
LE: loop exit
PB: predicated region body
PF: predicated region fallthrough
CT: control target
= control target key end

     0   :  { %s178_s15 = smov [#allocation3]   ;;  %s214_s0 = inlined_call_operand.hbm [shape: f32[3], index: 0, kind: input, shape index: {}]   ;;  %s215_s1 = inlined_call_operand.hbm [shape: f32[8,128], index: 1, kind: input, shape index: {}]   ;;  %s216_s2 = inlined_call_operand.hbm [shape: f32[8,128], index: 2, kind: input, shape index: {}]   ;;  %s217_s3 = inlined_call_operand.hbm [shape: f32[8,128], index: 3, kind: output, shape index: {}]  }
   0x1   :  { %s9_s14 = sshll.u32 %s214_s0, 4  ;;  %s10_s14 = int_to_ptr.hbm [resolvable:$true] %s9_s14 }
   0x2   :  { %12 = dma.hbm_to_smem %s10_s14, 16, %s178_s15, [#allocation2] }
   0x3   :  { %170 = dma.done.wait [#allocation2], 16 }
   0x4   :  { %171 = vsyncadd [#allocation2], 4294967280 }
   0x5   :  { %15 = sfence }
   0x6   :  { %16 = vsyncpa [#allocation5], 0 }
   0x7   :  { %17 = vsyncpa [#allocation8], 0 }
   0x8   :  { %18 = vsyncpa [#allocation6], 0  ;;  %s24_s18 = sshll.u32 %s215_s1, 4  ;;  %s179_s19 = smov [#allocation4]   ;;  %s25_s18 = int_to_ptr.hbm [resolvable:$true] %s24_s18 }
   0x9   :  { %s26_s20 = sshll.u32 %s179_s19, 4  ;;  %s35_s0 = sshll.u32 %s216_s2, 4  ;;  %s27_s20 = int_to_ptr.vmem [resolvable:$true] %s26_s20  ;;  %s36_s0 = int_to_ptr.hbm [resolvable:$true] %s35_s0 }
   0xa   :  { %29 = dma.hbm_to_vmem [thread:$0]  %s25_s18, 128, %s27_s20, [#allocation5]  }
   0xb   :  { %s180_s23 = smov [#allocation7]  }
   0xc   :  { %s37_s24 = sshll.u32 %s180_s23, 4  ;;  %s38_s24 = int_to_ptr.vmem [resolvable:$true] %s37_s24 }
   0xd   :  { %40 = dma.hbm_to_vmem [thread:$0]  %s36_s0, 128, %s38_s24, [#allocation8]  }
   0xe   :  { %172 = dma.done.wait [#allocation5], 128  }
   0xf   :  { %173 = vsyncadd [#allocation5], 4294967168 }
  0x10   :  { %174 = dma.done.wait [#allocation8], 128  }
  0x11   :  { %175 = vsyncadd [#allocation8], 4294967168  ;;  %s50_s25 = sld [smem:[#allocation3]]  ;;  %v49_v0 = vld [vmem:[#allocation4] sm:$0xff]  ;;  %v53_v2 = vld [vmem:[#allocation7] sm:$0xff]  ;;  %s181_s2 = smov [#allocation9]  }
  0x12   :  { %s80_s1 = sld [smem:[#allocation3 + $0x1]]  ;;  %s67_s27 = sshll.u32 %s181_s2, 4  ;;  %s68_s27 = int_to_ptr.vmem [resolvable:$true] %s67_s27 }
  0x13   :  { %s81_s26 = sld [smem:[#allocation3 + $0x2]]  ;;  %s69_s30 = sshll.u32 %s217_s3, 4  ;;  %s70_s30 = int_to_ptr.hbm [resolvable:$true] %s69_s30 }
  0x17   :  { %v51_v1 = vstv %s50_s25 }
  0x18   :  { %v52_v3 = vmul.f32 %v51_v1, %v49_v0  ;;  %v55_v4 = vstv %s80_s1 }
  0x19   :  { %v56_v5 = vmul.f32 %v55_v4, %v53_v2  ;;  %v59_v6 = vstv %s81_s26 }
  0x1b   :  { %v57_v7 = vadd.f32 %v56_v5, %v52_v3 }
  0x1d   :  { %v60_v8 = vadd.f32 %v59_v6, %v57_v7 }
  0x1f   :  { %61 = vst [vmem:[#allocation9] sm:$0xff] %v60_v8 }
  0x20   :  { %72 = dma.vmem_to_hbm [thread:$0]  %s68_s27, 128, %s70_s30, [#allocation6]  }
  0x21   :  { %176 = dma.done.wait [#allocation6], 128  }
  0x22   :  { %177 = vsyncadd [#allocation6], 4294967168 }
  0x23   :  { %77 = vsyncpa [#allocation5], 1 }
  0x24   :  { %78 = vsyncpa [#allocation8], 1 }
  0x25   :  { %79 = vsyncpa [#allocation6], 1 }

</bundles_post_ra>
